<compile_context>
chip_gen: v7x
topology: tpu7x:2x2x1
jax: 0.10.0
libtpu: 0.0.40
codegen_flags: <defaults>
</compile_context>

<pallas_src>
import math

import jax
import jax.numpy as jnp
from jax.experimental import pallas as pl
from jax.experimental.pallas import tpu as pltpu


def _round_up(x, n):
    return ((x + n - 1) // n) * n


def _cat_linear_kernel(xi_ref, x_ref, w_xi_ref, w_x_ref, b_ref, o_ref):
    # cat([xi, x], -1) @ W  ==  xi @ W_top + x @ W_bot   (f32 accumulation)
    acc = jnp.dot(xi_ref[...], w_xi_ref[...], preferred_element_type=jnp.float32)
    acc = acc + jnp.dot(x_ref[...], w_x_ref[...], preferred_element_type=jnp.float32)
    o_ref[...] = (acc + b_ref[...]).astype(o_ref.dtype)


def cat_enc_forward(encoded_x, encoded_xi, weight, bias, *, tile_m=1024):
    """Pallas implementation of CatEnc with net = Linear.

    encoded_x : (..., D_x)
    encoded_xi: (..., D_xi)
    weight    : (D_xi + D_x, D_out)   (already transposed vs torch's (out, in))
    bias      : (D_out,)
    returns   : (..., D_out)
    """
    lead = encoded_x.shape[:-1]
    d_x = encoded_x.shape[-1]
    d_xi = encoded_xi.shape[-1]
    d_out = weight.shape[-1]
    assert weight.shape[0] == d_xi + d_x
    assert encoded_xi.shape[:-1] == lead

    m = math.prod(lead) if lead else 1
    if m == 0:
        return jnp.zeros((*lead, d_out), dtype=encoded_x.dtype)

    x2 = encoded_x.reshape(m, d_x)
    xi2 = encoded_xi.reshape(m, d_xi)

    # Split the weight to match the concat order [encoded_xi, encoded_x].
    w_xi = weight[:d_xi, :]
    w_x = weight[d_xi:, :]
    b2 = bias.reshape(1, d_out)

    # Row-axis tile: multiple of 8 (sublane), capped so double-buffered
    # input/output tiles stay well under the scoped VMEM limit on every
    # generation (v5e/v6e 32 MiB default scoped, v7x 64 MiB physical).
    tile = min(tile_m, _round_up(m, 8))
    m_pad = pl.cdiv(m, tile) * tile
    if m_pad != m:
        pad = m_pad - m
        xi2 = jnp.pad(xi2, ((0, pad), (0, 0)))
        x2 = jnp.pad(x2, ((0, pad), (0, 0)))

    grid = (m_pad // tile,)

    flops = 2 * m_pad * (d_xi + d_x) * d_out
    bytes_accessed = 4 * (
        m_pad * (d_xi + d_x + d_out) + (d_xi + d_x) * d_out + d_out
    )

    out = pl.pallas_call(
        _cat_linear_kernel,
        out_shape=jax.ShapeDtypeStruct((m_pad, d_out), encoded_x.dtype),
        grid=grid,
        in_specs=[
            pl.BlockSpec((tile, d_xi), lambda i: (i, 0)),
            pl.BlockSpec((tile, d_x), lambda i: (i, 0)),
            # Weights / bias: constant index_map -> VMEM-resident across grid.
            pl.BlockSpec((d_xi, d_out), lambda i: (0, 0)),
            pl.BlockSpec((d_x, d_out), lambda i: (0, 0)),
            pl.BlockSpec((1, d_out), lambda i: (0, 0)),
        ],
        out_specs=pl.BlockSpec((tile, d_out), lambda i: (i, 0)),
        compiler_params=pltpu.CompilerParams(
            dimension_semantics=("parallel",),
            vmem_limit_bytes=64 * 1024 * 1024,
        ),
        cost_estimate=pl.CostEstimate(
            flops=flops, transcendentals=0, bytes_accessed=bytes_accessed
        ),
    )(xi2, x2, w_xi, w_x, b2)

    if m_pad != m:
        out = out[:m]
    return out.reshape(*lead, d_out)


if __name__ == "__main__":
    key = jax.random.PRNGKey(0)
    k1, k2, k3, k4 = jax.random.split(key, 4)

    # Small shapes consistent with the forward pass: two encoded feature maps
    # sharing leading dims, concatenated on the last (feature) axis.
    B, S = 2, 8
    D_X, D_XI, D_OUT = 32, 32, 32

    encoded_x = jax.random.normal(k1, (B, S, D_X), dtype=jnp.float32)
    encoded_xi = jax.random.normal(k2, (B, S, D_XI), dtype=jnp.float32)

    # Deterministic parameters for the wrapped net (Linear(D_XI + D_X -> D_OUT)).
    weight = jax.random.normal(k3, (D_XI + D_X, D_OUT), dtype=jnp.float32) * 0.05
    bias = jax.random.normal(k4, (D_OUT,), dtype=jnp.float32) * 0.05

    out = cat_enc_forward(encoded_x, encoded_xi, weight, bias)
    out = jax.block_until_ready(out)

    # Pure-JAX reference: concat then linear (mirrors the PyTorch forward).
    ref = jnp.concatenate([encoded_xi, encoded_x], axis=-1) @ weight + bias
    assert out.shape == (B, S, D_OUT)
    assert jnp.allclose(out, ref, atol=1e-5, rtol=1e-5)

    print("KERNEL_OK")
</pallas_src>

<mosaic_0001>
module attributes {stable_mosaic.version = 11 : i64} {
  func.func @_cat_linear_kernel(%arg0: i32, %arg1: memref<16x32xf32, #tpu.memory_space<vmem>>, %arg2: memref<16x32xf32, #tpu.memory_space<vmem>>, %arg3: memref<32x32xf32, #tpu.memory_space<vmem>>, %arg4: memref<32x32xf32, #tpu.memory_space<vmem>>, %arg5: memref<1x32xf32, #tpu.memory_space<vmem>>, %arg6: memref<16x32xf32, #tpu.memory_space<vmem>>) attributes {dimension_semantics = [#tpu.dimension_semantics<parallel>], iteration_bounds = array<i64: 1>, scalar_prefetch = 0 : i64, scratch_operands = 0 : i64, tpu.core_type = #tpu.core_type<tc>, window_params = [{transform_indices = @transform_0, window_bounds = array<i64: 16, 32>}, {transform_indices = @transform_1, window_bounds = array<i64: 16, 32>}, {pipeline_mode = #tpu.pipeline_mode<synchronous>, transform_indices = @transform_2, window_bounds = array<i64: 32, 32>}, {pipeline_mode = #tpu.pipeline_mode<synchronous>, transform_indices = @transform_3, window_bounds = array<i64: 32, 32>}, {pipeline_mode = #tpu.pipeline_mode<synchronous>, transform_indices = @transform_4, window_bounds = array<i64: 1, 32>}, {transform_indices = @transform_5, window_bounds = array<i64: 16, 32>}]} {
    %c0 = arith.constant 0 : index
    %c0_0 = arith.constant 0 : index
    %0 = vector.load %arg1[%c0, %c0_0] : memref<16x32xf32, #tpu.memory_space<vmem>>, vector<16x32xf32>
    %c0_1 = arith.constant 0 : index
    %c0_2 = arith.constant 0 : index
    %1 = vector.load %arg3[%c0_1, %c0_2] : memref<32x32xf32, #tpu.memory_space<vmem>>, vector<32x32xf32>
    %cst = arith.constant dense<0.000000e+00> : vector<16x32xf32>
    %2 = tpu.matmul %0, %1, %cst {dimension_numbers = #tpu.dot_dimension_numbers<[1], [0], [0], [1], [0, 0, 1, 1], [], []>} : vector<16x32xf32>, vector<32x32xf32>, vector<16x32xf32> -> vector<16x32xf32>
    %c0_3 = arith.constant 0 : index
    %c0_4 = arith.constant 0 : index
    %3 = vector.load %arg2[%c0_3, %c0_4] : memref<16x32xf32, #tpu.memory_space<vmem>>, vector<16x32xf32>
    %c0_5 = arith.constant 0 : index
    %c0_6 = arith.constant 0 : index
    %4 = vector.load %arg4[%c0_5, %c0_6] : memref<32x32xf32, #tpu.memory_space<vmem>>, vector<32x32xf32>
    %cst_7 = arith.constant dense<0.000000e+00> : vector<16x32xf32>
    %5 = tpu.matmul %3, %4, %cst_7 {dimension_numbers = #tpu.dot_dimension_numbers<[1], [0], [0], [1], [0, 0, 1, 1], [], []>} : vector<16x32xf32>, vector<32x32xf32>, vector<16x32xf32> -> vector<16x32xf32>
    %6 = arith.addf %2, %5 : vector<16x32xf32>
    %c0_8 = arith.constant 0 : index
    %c0_9 = arith.constant 0 : index
    %7 = vector.load %arg5[%c0_8, %c0_9] : memref<1x32xf32, #tpu.memory_space<vmem>>, vector<1x32xf32>
    %8 = vector.broadcast %7 : vector<1x32xf32> to vector<16x32xf32>
    %9 = arith.addf %6, %8 : vector<16x32xf32>
    %c0_10 = arith.constant 0 : index
    %c0_11 = arith.constant 0 : index
    %10 = vector.load %arg6[%c0_10, %c0_11] : memref<16x32xf32, #tpu.memory_space<vmem>>, vector<16x32xf32>
    tpu.vector_store %arg6[%c0_10, %c0_11], %9 {strides = array<i32>} : memref<16x32xf32, #tpu.memory_space<vmem>>, vector<16x32xf32>,
    return
  }
  func.func @transform_0(%arg0: i32) -> (i32, i32) {
    %c0_i32 = arith.constant 0 : i32
    %c0_i32_0 = arith.constant 0 : i32
    return %arg0, %c0_i32 : i32, i32
  }
  func.func @transform_1(%arg0: i32) -> (i32, i32) {
    %c0_i32 = arith.constant 0 : i32
    %c0_i32_0 = arith.constant 0 : i32
    return %arg0, %c0_i32 : i32, i32
  }
  func.func @transform_2(%arg0: i32) -> (i32, i32) {
    %c0_i32 = arith.constant 0 : i32
    %c0_i32_0 = arith.constant 0 : i32
    %c0_i32_1 = arith.constant 0 : i32
    return %c0_i32, %c0_i32_0 : i32, i32
  }
  func.func @transform_3(%arg0: i32) -> (i32, i32) {
    %c0_i32 = arith.constant 0 : i32
    %c0_i32_0 = arith.constant 0 : i32
    %c0_i32_1 = arith.constant 0 : i32
    return %c0_i32, %c0_i32_0 : i32, i32
  }
  func.func @transform_4(%arg0: i32) -> (i32, i32) {
    %c0_i32 = arith.constant 0 : i32
    %c0_i32_0 = arith.constant 0 : i32
    %c0_i32_1 = arith.constant 0 : i32
    return %c0_i32, %c0_i32_0 : i32, i32
  }
  func.func @transform_5(%arg0: i32) -> (i32, i32) {
    %c0_i32 = arith.constant 0 : i32
    %c0_i32_0 = arith.constant 0 : i32
    return %arg0, %c0_i32 : i32, i32
  }
}

</mosaic_0001>

<bundles_post_ra>
// kernel: tpu_custom_call.1
= control target key start
LH: loop header
LB: loop body
LE: loop exit
PB: predicated region body
PF: predicated region fallthrough
CT: control target
= control target key end

     0   :  { %10 = vsyncpa [#allocation3], 0  ;;  %s642_s0 = inlined_call_operand.hbm [shape: f32[16,32], index: 0, kind: input, shape index: {}]   ;;  %s643_s1 = inlined_call_operand.hbm [shape: f32[16,32], index: 1, kind: input, shape index: {}]   ;;  %s644_s2 = inlined_call_operand.hbm [shape: f32[32,32], index: 2, kind: input, shape index: {}]   ;;  %s645_s3 = inlined_call_operand.hbm [shape: f32[32,32], index: 3, kind: input, shape index: {}]   ;;  %s646_s4 = inlined_call_operand.hbm [shape: f32[1,32], index: 4, kind: input, shape index: {}]   ;;  %s647_s5 = inlined_call_operand.hbm [shape: f32[16,32], index: 5, kind: output, shape index: {}]  }
   0x1   :  { %11 = vsyncpa [#allocation6], 0 }
   0x2   :  { %12 = vsyncpa [#allocation9], 0 }
   0x3   :  { %13 = vsyncpa [#allocation4], 0  ;;  %s497_s18 = smov [#allocation5]   ;;  %s498_s20 = smov [#allocation8]  }
   0x4   :  { %s31_s19 = sshll.u32 %s497_s18, 4  ;;  %s55_s21 = sshll.u32 %s498_s20, 4  ;;  %s32_s19 = int_to_ptr.vmem [resolvable:$true] %s31_s19  ;;  %s535_s21 = int_to_ptr.vmem [resolvable:$true] %s55_s21 }
   0x5   :  { %s357_s24 = scalar_lea.hbm %s643_s1, 256 }
   0x6   :  { %p358_p0 = scmp.ne.s32.totalorder %s643_s1, %s357_s24  ;;  %p361_p1 = scmp.lt.u32.totalorder %s357_s24, %s643_s1 }
   0x8   :  { %p363_p2 = pnand %p361_p1, %p358_p0 }
   0xa   :  { %366 = shalt.err (!%p363_p2)
}
   0xb   :  { %s367_s29 = scalar_lea.vmem %s32_s19, 256  ;;  %p372_p4 = scmp.lt.s32.totalorder %s32_s19, %s32_s19 }
   0xc   :  { %p368_p3 = scmp.ne.s32.totalorder %s32_s19, %s367_s29  ;;  %p373_p5 = scmp.lt.s32.totalorder %s367_s29, %s367_s29 }
   0xe   :  { %p374_p6 = por %p373_p5, %p372_p4 }
  0x10   :  { %p375_p7 = pnand %p374_p6, %p368_p3 }
  0x12   :  { %378 = shalt.err (!%p375_p7)
}
  0x13   :  { %s499_s30 = smov 128   ;;  %s500_s6 = smov 8  }
  0x14   :  { %37 = dma.hbm_to_vmem [thread:$0]  %s643_s1, 256, %s32_s19, [#allocation6], %s499_s30, %s499_s30, %s500_s6  }
  0x15   :  { %s379_s11 = scalar_lea.hbm %s645_s3, 512 }
  0x16   :  { %p380_p8 = scmp.ne.s32.totalorder %s645_s3, %s379_s11  ;;  %p383_p9 = scmp.lt.u32.totalorder %s379_s11, %s645_s3 }
  0x18   :  { %p385_p10 = pnand %p383_p9, %p380_p8 }
  0x1a   :  { %388 = shalt.err (!%p385_p10)
}
  0x1b   :  { %s389_s16 = scalar_lea.vmem %s535_s21, 512  ;;  %p394_p12 = scmp.lt.s32.totalorder %s535_s21, %s535_s21 }
  0x1c   :  { %p390_p11 = scmp.ne.s32.totalorder %s535_s21, %s389_s16  ;;  %p395_p13 = scmp.lt.s32.totalorder %s389_s16, %s389_s16 }
  0x1e   :  { %p396_p0 = por %p395_p13, %p394_p12 }
  0x20   :  { %p397_p1 = pnand %p396_p0, %p390_p11 }
  0x22   :  { %400 = shalt.err (!%p397_p1)
}
  0x23   :  { %61 = dma.hbm_to_vmem [thread:$0]  %s645_s3, 512, %s535_s21, [#allocation9], %s499_s30, %s499_s30, %s500_s6  }
  0x24   :  { %s501_s18 = smov [#allocation2]   ;;  %s502_s20 = smov [#allocation7]  }
  0x25   :  { %s19_s19 = sshll.u32 %s501_s18, 4  ;;  %s43_s22 = sshll.u32 %s502_s20, 4  ;;  %s20_s19 = int_to_ptr.vmem [resolvable:$true] %s19_s19  ;;  %s572_s22 = int_to_ptr.vmem [resolvable:$true] %s43_s22 }
  0x26   :  { %s401_s25 = scalar_lea.hbm %s642_s0, 256 }
  0x27   :  { %p402_p2 = scmp.ne.s32.totalorder %s642_s0, %s401_s25  ;;  %p405_p3 = scmp.lt.u32.totalorder %s401_s25, %s642_s0 }
  0x29   :  { %p407_p4 = pnand %p405_p3, %p402_p2 }
  0x2b   :  { %410 = shalt.err (!%p407_p4)
}
  0x2c   :  { %s411_s3 = scalar_lea.vmem %s20_s19, 256  ;;  %p416_p6 = scmp.lt.s32.totalorder %s20_s19, %s20_s19 }
  0x2d   :  { %p412_p5 = scmp.ne.s32.totalorder %s20_s19, %s411_s3  ;;  %p417_p7 = scmp.lt.s32.totalorder %s411_s3, %s411_s3 }
  0x2f   :  { %p418_p8 = por %p417_p7, %p416_p6 }
  0x31   :  { %p419_p9 = pnand %p418_p8, %p412_p5 }
  0x33   :  { %422 = shalt.err (!%p419_p9)
}
  0x34   :  { %25 = dma.hbm_to_vmem [thread:$0]  %s642_s0, 256, %s20_s19, [#allocation3], %s499_s30, %s499_s30, %s500_s6  }
  0x35   :  { %s423_s10 = scalar_lea.hbm %s644_s2, 512 }
  0x36   :  { %p424_p10 = scmp.ne.s32.totalorder %s644_s2, %s423_s10  ;;  %p427_p11 = scmp.lt.u32.totalorder %s423_s10, %s644_s2 }
  0x38   :  { %p429_p12 = pnand %p427_p11, %p424_p10 }
  0x3a   :  { %432 = shalt.err (!%p429_p12)
}
  0x3b   :  { %s433_s15 = scalar_lea.vmem %s572_s22, 512  ;;  %p438_p0 = scmp.lt.s32.totalorder %s572_s22, %s572_s22 }
  0x3c   :  { %p434_p13 = scmp.ne.s32.totalorder %s572_s22, %s433_s15  ;;  %p439_p1 = scmp.lt.s32.totalorder %s433_s15, %s433_s15 }
  0x3e   :  { %p440_p2 = por %p439_p1, %p438_p0 }
  0x40   :  { %p441_p3 = pnand %p440_p2, %p434_p13 }
  0x42   :  { %444 = shalt.err (!%p441_p3)
}
  0x43   :  { %49 = dma.hbm_to_vmem [thread:$0]  %s644_s2, 512, %s572_s22, [#allocation6], %s499_s30, %s499_s30, %s500_s6  }
  0x44   :  { %s503_s1 = smov [#allocation10]   ;;  %s445_s20 = scalar_lea.hbm %s646_s4, 16 }
  0x45   :  { %s68_s17 = sshll.u32 %s503_s1, 4  ;;  %p446_p4 = scmp.ne.s32.totalorder %s646_s4, %s445_s20  ;;  %s69_s17 = int_to_ptr.vmem [resolvable:$true] %s68_s17 }
  0x46   :  { %p449_p5 = scmp.lt.u32.totalorder %s445_s20, %s646_s4 }
  0x48   :  { %p451_p6 = pnand %p449_p5, %p446_p4 }
  0x4a   :  { %454 = shalt.err (!%p451_p6)
}
  0x4b   :  { %s455_s27 = scalar_lea.vmem %s69_s17, 16  ;;  %s459_s2 = scalar_lea.vmem %s69_s17, 32 }
  0x4c   :  { %p456_p7 = scmp.ne.s32.totalorder %s69_s17, %s455_s27  ;;  %p460_p8 = scmp.lt.s32.totalorder %s69_s17, %s69_s17 }
  0x4d   :  { %p461_p9 = scmp.lt.s32.totalorder %s459_s2, %s455_s27 }
  0x4f   :  { %p462_p10 = por %p461_p9, %p460_p8 }
  0x51   :  { %p463_p11 = pnand %p462_p10, %p456_p7 }
  0x53   :  { %466 = shalt.err (!%p463_p11)
}
  0x54   :  { %71 = dma.hbm_to_vmem [thread:$0]  %s646_s4, 16, %s69_s17, [#allocation9]  }
  0x55   :  { %489 = dma.done.wait [#allocation3], 256  }
  0x56   :  { %490 = vsyncadd [#allocation3], 4294967040 }
  0x57   :  { %491 = dma.done.wait [#allocation6], 768  }
  0x58   :  { %492 = vsyncadd [#allocation6], 4294966528 }
  0x59   :  { %493 = dma.done.wait [#allocation9], 528  }
  0x5a   :  { %494 = vsyncadd [#allocation9], 4294966768  ;;  %v95_v0 = vld [vmem:[#allocation8] sm:$0xff]  ;;  %v96_v1 = vld [vmem:[#allocation8 + $0x8] sm:$0xff]  ;;  %vm99_vm0 = vcmask 261120   ;;  %s504_s4 = smov [#allocation11]  }
  0x5b   :  { %v89_v2 = vld [vmem:[#allocation7] sm:$0xff]  ;;  %v331_v3 = vpack.c.bf16 %v96_v1, %v95_v0  ;;  %v90_v4 = vld [vmem:[#allocation7 + $0x8] sm:$0xff]  ;;  %v97_v5 = vld [vmem:[#allocation8 + $0x10] sm:$0xff]  ;;  %s278_s29 = sshll.u32 %s504_s4, 4  ;;  %s279_s29 = int_to_ptr.vmem [resolvable:$true] %s278_s29 }
  0x5c   :  { %v98_v6 = vld [vmem:[#allocation8 + $0x18] sm:$0xff]  ;;  %v339_v7 = vpack.c.bf16 %v90_v4, %v89_v2  ;;  %v91_v9 = vld [vmem:[#allocation7 + $0x10] sm:$0xff]  ;;  %v87_v13 = vld [vmem:[#allocation2] sm:$0xff]  ;;  %s467_s3 = scalar_lea.vmem %s279_s29, 256  ;;  %p472_p13 = scmp.lt.s32.totalorder %s279_s29, %s279_s29 }
  0x5d   :  { %v335_v8 = vpack.c.bf16 %v98_v6, %v97_v5  ;;  %v92_v10 = vld [vmem:[#allocation7 + $0x18] sm:$0xff]  ;;  %v93_v11 = vld [vmem:[#allocation5] sm:$0xff]  ;;  %332 = vmatprep.subr.bf16.mxu1 %v331_v3  ;;  %328 = vmatprep.mubr.msk.f32.mxu0 %vm99_vm0, %v87_v13  ;;  %v88_v15 = vld [vmem:[#allocation2 + $0x8] sm:$0xff]  ;;  %p468_p12 = scmp.ne.s32.totalorder %s279_s29, %s467_s3  ;;  %p473_p0 = scmp.lt.s32.totalorder %s467_s3, %s467_s3 }
  0x5e   :  { %v343_v12 = vpack.c.bf16 %v92_v10, %v91_v9  ;;  %317 = vmatprep.mubr.msk.f32.mxu1 %vm99_vm0, %v93_v11  ;;  %340 = vmatprep.subr.bf16.mxu0 %v339_v7  ;;  %v94_v14 = vld [vmem:[#allocation5 + $0x8] sm:$0xff]  ;;  %v296_v18 = vld [vmem:[#allocation10] ss:$0 sm:$0xff] }
  0x5f   :  { %334 = vmatpush3.bf16.msra.mxu1 %v331_v3  ;;  %342 = vmatpush3.bf16.msra.mxu0 %v339_v7  ;;  %p474_p1 = por %p473_p0, %p472_p13 }
  0x60   :  { %336 = vmatprep.subr.bf16.mxu1 %v335_v8  ;;  %344 = vmatprep.subr.bf16.mxu0 %v343_v12 }
  0x61   :  { %p475_p2 = pnand %p474_p1, %p468_p12 }
  0x63   :  { %338 = vmatpush3.bf16.msra.mxu1 %v335_v8  ;;  %346 = vmatpush3.bf16.msra.mxu0 %v343_v12 }
  0x66   :  { %318 = vmatmul.mubr.msk.f32.vlgmr.msra.gmra.mrb[0].mxu1 %vm99_vm0, %v94_v14  ;;  %329 = vmatmul.mubr.msk.f32.vlgmr.msra.gmra.mrb[0].mxu0 %vm99_vm0, %v88_v15 }
 0x139   :  { %v319_v16 = vpop.f32.mrb[0].mxu1  ;;  %v330_v17 = vpop.f32.mrb[0].mxu0 }
 0x13a   :  { %v172_v19 = vpop.f32.mrb[1].mxu1  ;;  %v259_v20 = vadd.f32 %v330_v17, %v319_v16  ;;  %v253_v21 = vpop.f32.mrb[1].mxu0 }
 0x13b   :  { %v254_v22 = vadd.f32 %v253_v21, %v172_v19 }
 0x13c   :  { %v270_v23 = vadd.f32 %v296_v18, %v259_v20 }
 0x13d   :  { %v269_v24 = vadd.f32 %v296_v18, %v254_v22 }
 0x13e   :  { %272 = vst.msk [vmem:[#allocation11 + $0x8] sm:$0xff] %vm99_vm0, %v270_v23 }
 0x13f   :  { %271 = vst.msk [vmem:[#allocation11] sm:$0xff] %vm99_vm0, %v269_v24 }
 0x140   :  { %478 = shalt.err (!%p475_p2)
}
 0x141   :  { %s479_s8 = scalar_lea.hbm %s647_s5, 256 }
 0x142   :  { %p480_p3 = scmp.ne.s32.totalorder %s647_s5, %s479_s8  ;;  %p483_p4 = scmp.lt.u32.totalorder %s479_s8, %s647_s5 }
 0x144   :  { %p485_p5 = pnand %p483_p4, %p480_p3 }
 0x146   :  { %488 = shalt.err (!%p485_p5)
}
 0x147   :  { %284 = dma.vmem_to_hbm [thread:$0]  %s279_s29, 256, %s647_s5, [#allocation4], %s499_s30, %s499_s30, %s500_s6  }
 0x148   :  { %495 = dma.done.wait [#allocation4], 256  }
 0x149   :  { %496 = vsyncadd [#allocation4], 4294967040 }
 0x14a   :  { %288 = vsyncpa [#allocation3], 1 }
 0x14b   :  { %289 = vsyncpa [#allocation6], 1 }
 0x14c   :  { %290 = vsyncpa [#allocation9], 1 }
 0x14d   :  { %291 = vsyncpa [#allocation4], 1 }

</bundles_post_ra>
